<compile_context>
chip_gen: v7x
topology: tpu7x:2x2x1
jax: 0.10.0
libtpu: 0.0.40
codegen_flags: <defaults>
</compile_context>

<pallas_src>
import functools

import jax
import jax.numpy as jnp
from jax.experimental import pallas as pl
from jax.experimental.pallas import tpu as pltpu


_LANE = 128   # lane width of a vreg
_SUBLANE = 8  # sublane count of a vreg


def _round_up(a: int, b: int) -> int:
    return (a + b - 1) // b * b


def _vmem_capacity_bytes() -> int:
    """Per-core VMEM capacity; conservative fallback if the query is unavailable."""
    try:
        return int(pltpu.get_tpu_info().vmem_capacity_bytes)
    except Exception:
        return 64 * 1024 * 1024  # v7x per-TC size (smallest of the three generations)


def ins_mlp_kernel(x_ref, w1_ref, b1_ref, w2_ref, b2_ref, logits_ref, h_ref):
    """Fused: h = relu(x @ W1 + b1); logits = h @ W2 + b2 (one row tile)."""
    # Cast the streamed activations to the (pre-cast) weight dtype in-kernel.
    x = x_ref[...].astype(w1_ref.dtype)                       # (TN, D)
    # feature extractor: Linear + ReLU, f32 accumulation on the MXU.
    h = jnp.dot(x, w1_ref[...], preferred_element_type=jnp.float32)
    h = jnp.maximum(h + b1_ref[...], 0.0)                     # bias + ReLU in f32 (VPU)
    h_ref[...] = h.astype(h_ref.dtype)                        # bf16 writeback (half bytes)
    # classifier: Linear, operands back to the weight dtype for the MXU.
    logits = jnp.dot(h.astype(w2_ref.dtype), w2_ref[...],
                     preferred_element_type=jnp.float32)
    logits_ref[...] = (logits + b2_ref[...]).astype(logits_ref.dtype)


def ins_mlp_forward(inp, w1, b1, w2, b2, n_class, *,
                    tile_n=None, out_h_dtype=jnp.bfloat16):
    """inp: (1, N, D). Weights stored (in, out) -- pass them pre-cast (e.g. bf16).

    Returns (class_prob (N, n_class) f32, h (N, H) out_h_dtype)."""
    x = jnp.squeeze(inp, axis=0)                               # == input.squeeze(0)
    N, D = x.shape
    H = w1.shape[1]
    C = int(n_class)

    # Biases are tiny; keep/add them in f32 regardless of weight dtype.
    b1 = b1.reshape(1, H).astype(jnp.float32)
    b2 = b2.reshape(1, C).astype(jnp.float32)

    vmem_cap = _vmem_capacity_bytes()
    if tile_n is None:
        # Bigger default tile on 128 MiB parts (v5e/v6e); smaller under v7x's 64 MiB/TC.
        tile_n = 1024 if vmem_cap >= (96 << 20) else 512

    # Row tile: sublane-aligned, and clamped so the grid keeps >= 2 steps when N
    # allows it (v7x megacore split across 2 TCs + DMA/compute overlap).
    Np8 = _round_up(N, _SUBLANE)
    TN = min(_round_up(tile_n, _SUBLANE), Np8)
    if Np8 >= 2 * _SUBLANE:
        TN = min(TN, _round_up(pl.cdiv(Np8, 2), _SUBLANE))
    Np = _round_up(N, TN)
    grid_n = Np // TN

    # Row padding only if required by the tile (no column padding anywhere).
    if Np != N:
        x = jnp.pad(x, ((0, Np - N), (0, 0)))

    x_item = jnp.dtype(x.dtype).itemsize
    w1_item = jnp.dtype(w1.dtype).itemsize
    w2_item = jnp.dtype(w2.dtype).itemsize
    h_item = jnp.dtype(out_h_dtype).itemsize

    # VMEM budget: resident weights/biases (compiler double-buffers by default),
    # double-buffered activation/output tiles, plus in-kernel f32 temporaries.
    resident = 2 * (D * H * w1_item + H * C * w2_item + H * 4 + C * 4)
    stream = 2 * (TN * D * x_item + TN * H * h_item + TN * C * 4)
    temps = TN * H * (4 + w2_item) + TN * C * 4      # f32 h + its cast + f32 logits
    vmem_needed = resident + stream + temps + (2 << 20)
    vmem_limit = int(max(4 << 20, min(vmem_needed, int(0.75 * vmem_cap))))

    cost = pl.CostEstimate(
        flops=2 * Np * D * H + 2 * Np * H * C,
        transcendentals=0,
        bytes_accessed=(Np * D * x_item + D * H * w1_item + H * C * w2_item
                        + H * 4 + C * 4 + Np * H * h_item + Np * C * 4),
    )

    logits, h = pl.pallas_call(
        ins_mlp_kernel,
        out_shape=(
            jax.ShapeDtypeStruct((Np, C), jnp.float32),     # logits: tiny, keep f32
            jax.ShapeDtypeStruct((Np, H), out_h_dtype),     # h: bf16 halves HBM writeback
        ),
        grid_spec=pltpu.PrefetchScalarGridSpec(
            num_scalar_prefetch=0,
            grid=(grid_n,),
            in_specs=[
                pl.BlockSpec((TN, D), lambda i: (i, 0)),    # activation stream: row-tiled
                pl.BlockSpec((D, H), lambda i: (0, 0)),     # weights/bias: VMEM-resident
                pl.BlockSpec((1, H), lambda i: (0, 0)),
                pl.BlockSpec((H, C), lambda i: (0, 0)),
                pl.BlockSpec((1, C), lambda i: (0, 0)),
            ],
            out_specs=[
                pl.BlockSpec((TN, C), lambda i: (i, 0)),    # full-dim C (no 128-pad blowup)
                pl.BlockSpec((TN, H), lambda i: (i, 0)),    # full-dim H
            ],
        ),
        compiler_params=pltpu.CompilerParams(
            dimension_semantics=("parallel",),              # megacore split on v7x
            vmem_limit_bytes=vmem_limit,
        ),
        cost_estimate=cost,
    )(x, w1, b1, w2, b2)

    # Only the (small) row padding, if any, needs stripping; columns are exact.
    if Np != N:
        logits = logits[:N]
        h = h[:N]
    class_prob = logits.reshape(-1, n_class)                  # no-op; matches PyTorch spec
    return class_prob, h


if __name__ == "__main__":
    # Small shapes consistent with the module: a bag of N instances.
    N, D, H, n_class = 8, 32, 64, 4

    key = jax.random.PRNGKey(0)
    k_in, k_w1, k_b1, k_w2, k_b2 = jax.random.split(key, 5)

    inp = jax.random.normal(k_in, (1, N, D), dtype=jnp.float32)

    # Parameters stored (in, out).  Weights are cast to bf16 ONCE here ("init"),
    # hoisted out of the per-call forward path; biases stay f32.
    bf16 = jnp.bfloat16
    w1 = (jax.random.normal(k_w1, (D, H), dtype=jnp.float32) * 0.1).astype(bf16)
    b1 = jax.random.normal(k_b1, (1, H), dtype=jnp.float32) * 0.1
    w2 = (jax.random.normal(k_w2, (H, n_class), dtype=jnp.float32) * 0.1).astype(bf16)
    b2 = jax.random.normal(k_b2, (1, n_class), dtype=jnp.float32) * 0.1

    fwd = jax.jit(functools.partial(ins_mlp_forward, n_class=n_class))
    class_prob, h = fwd(inp, w1, b1, w2, b2)
    jax.block_until_ready((class_prob, h))

    # Reference in plain JAX using the same bf16-operand / f32-accumulate recipe.
    x_r = jnp.squeeze(inp, 0)
    h_r = jnp.maximum(
        jnp.dot(x_r.astype(bf16), w1, preferred_element_type=jnp.float32)
        + b1, 0.0)
    logits_r = (jnp.dot(h_r.astype(bf16), w2, preferred_element_type=jnp.float32)
                + b2).reshape(-1, n_class)

    assert class_prob.shape == (N, n_class)
    assert class_prob.dtype == jnp.float32
    assert h.shape == (N, H)
    assert h.dtype == bf16
    assert jnp.allclose(class_prob, logits_r, atol=2e-2, rtol=2e-2)
    assert jnp.allclose(h.astype(jnp.float32), h_r, atol=2e-2, rtol=2e-2)

    print("KERNEL_OK")
</pallas_src>

<mosaic_0001>
module attributes {stable_mosaic.version = 11 : i64} {
  func.func @ins_mlp_kernel(%arg0: i32, %arg1: memref<8x32xf32, #tpu.memory_space<vmem>>, %arg2: memref<32x64xbf16, #tpu.memory_space<vmem>>, %arg3: memref<1x64xf32, #tpu.memory_space<vmem>>, %arg4: memref<64x4xbf16, #tpu.memory_space<vmem>>, %arg5: memref<1x4xf32, #tpu.memory_space<vmem>>, %arg6: memref<8x4xf32, #tpu.memory_space<vmem>>, %arg7: memref<8x64xbf16, #tpu.memory_space<vmem>>) attributes {dimension_semantics = [#tpu.dimension_semantics<parallel>], iteration_bounds = array<i64: 1>, scalar_prefetch = 0 : i64, scratch_operands = 0 : i64, tpu.core_type = #tpu.core_type<tc>, window_params = [{transform_indices = @transform_0, window_bounds = array<i64: 8, 32>}, {pipeline_mode = #tpu.pipeline_mode<synchronous>, transform_indices = @transform_1, window_bounds = array<i64: 32, 64>}, {pipeline_mode = #tpu.pipeline_mode<synchronous>, transform_indices = @transform_2, window_bounds = array<i64: 1, 64>}, {pipeline_mode = #tpu.pipeline_mode<synchronous>, transform_indices = @transform_3, window_bounds = array<i64: 64, 4>}, {pipeline_mode = #tpu.pipeline_mode<synchronous>, transform_indices = @transform_4, window_bounds = array<i64: 1, 4>}, {transform_indices = @transform_5, window_bounds = array<i64: 8, 4>}, {transform_indices = @transform_6, window_bounds = array<i64: 8, 64>}]} {
    %c0 = arith.constant 0 : index
    %c0_0 = arith.constant 0 : index
    %0 = vector.load %arg1[%c0, %c0_0] : memref<8x32xf32, #tpu.memory_space<vmem>>, vector<8x32xf32>
    %1 = arith.truncf %0 : vector<8x32xf32> to vector<8x32xbf16>
    %c0_1 = arith.constant 0 : index
    %c0_2 = arith.constant 0 : index
    %2 = vector.load %arg2[%c0_1, %c0_2] : memref<32x64xbf16, #tpu.memory_space<vmem>>, vector<32x64xbf16>
    %cst = arith.constant dense<0.000000e+00> : vector<8x64xf32>
    %3 = tpu.matmul %1, %2, %cst {dimension_numbers = #tpu.dot_dimension_numbers<[1], [0], [0], [1], [0, 0, 1, 1], [], []>} : vector<8x32xbf16>, vector<32x64xbf16>, vector<8x64xf32> -> vector<8x64xf32>
    %c0_3 = arith.constant 0 : index
    %c0_4 = arith.constant 0 : index
    %4 = vector.load %arg3[%c0_3, %c0_4] : memref<1x64xf32, #tpu.memory_space<vmem>>, vector<1x64xf32>
    %5 = vector.broadcast %4 : vector<1x64xf32> to vector<8x64xf32>
    %6 = arith.addf %3, %5 : vector<8x64xf32>
    %cst_5 = arith.constant 0.000000e+00 : f32
    %7 = vector.broadcast %cst_5 : f32 to vector<8x64xf32>
    %8 = arith.maximumf %6, %7 : vector<8x64xf32>
    %9 = arith.truncf %8 : vector<8x64xf32> to vector<8x64xbf16>
    %c0_6 = arith.constant 0 : index
    %c0_7 = arith.constant 0 : index
    %10 = vector.load %arg7[%c0_6, %c0_7] : memref<8x64xbf16, #tpu.memory_space<vmem>>, vector<8x64xbf16>
    tpu.vector_store %arg7[%c0_6, %c0_7], %9 {strides = array<i32>} : memref<8x64xbf16, #tpu.memory_space<vmem>>, vector<8x64xbf16>,
    %11 = arith.truncf %8 : vector<8x64xf32> to vector<8x64xbf16>
    %c0_8 = arith.constant 0 : index
    %c0_9 = arith.constant 0 : index
    %12 = vector.load %arg4[%c0_8, %c0_9] : memref<64x4xbf16, #tpu.memory_space<vmem>>, vector<64x4xbf16>
    %cst_10 = arith.constant dense<0.000000e+00> : vector<8x4xf32>
    %13 = tpu.matmul %11, %12, %cst_10 {dimension_numbers = #tpu.dot_dimension_numbers<[1], [0], [0], [1], [0, 0, 1, 1], [], []>} : vector<8x64xbf16>, vector<64x4xbf16>, vector<8x4xf32> -> vector<8x4xf32>
    %c0_11 = arith.constant 0 : index
    %c0_12 = arith.constant 0 : index
    %14 = vector.load %arg5[%c0_11, %c0_12] : memref<1x4xf32, #tpu.memory_space<vmem>>, vector<1x4xf32>
    %15 = vector.broadcast %14 : vector<1x4xf32> to vector<8x4xf32>
    %16 = arith.addf %13, %15 : vector<8x4xf32>
    %c0_13 = arith.constant 0 : index
    %c0_14 = arith.constant 0 : index
    %17 = vector.load %arg6[%c0_13, %c0_14] : memref<8x4xf32, #tpu.memory_space<vmem>>, vector<8x4xf32>
    tpu.vector_store %arg6[%c0_13, %c0_14], %16 {strides = array<i32>} : memref<8x4xf32, #tpu.memory_space<vmem>>, vector<8x4xf32>,
    return
  }
  func.func @transform_0(%arg0: i32) -> (i32, i32) {
    %c0_i32 = arith.constant 0 : i32
    %c0_i32_0 = arith.constant 0 : i32
    return %arg0, %c0_i32 : i32, i32
  }
  func.func @transform_1(%arg0: i32) -> (i32, i32) {
    %c0_i32 = arith.constant 0 : i32
    %c0_i32_0 = arith.constant 0 : i32
    %c0_i32_1 = arith.constant 0 : i32
    return %c0_i32, %c0_i32_0 : i32, i32
  }
  func.func @transform_2(%arg0: i32) -> (i32, i32) {
    %c0_i32 = arith.constant 0 : i32
    %c0_i32_0 = arith.constant 0 : i32
    %c0_i32_1 = arith.constant 0 : i32
    return %c0_i32, %c0_i32_0 : i32, i32
  }
  func.func @transform_3(%arg0: i32) -> (i32, i32) {
    %c0_i32 = arith.constant 0 : i32
    %c0_i32_0 = arith.constant 0 : i32
    %c0_i32_1 = arith.constant 0 : i32
    return %c0_i32, %c0_i32_0 : i32, i32
  }
  func.func @transform_4(%arg0: i32) -> (i32, i32) {
    %c0_i32 = arith.constant 0 : i32
    %c0_i32_0 = arith.constant 0 : i32
    %c0_i32_1 = arith.constant 0 : i32
    return %c0_i32, %c0_i32_0 : i32, i32
  }
  func.func @transform_5(%arg0: i32) -> (i32, i32) {
    %c0_i32 = arith.constant 0 : i32
    %c0_i32_0 = arith.constant 0 : i32
    return %arg0, %c0_i32 : i32, i32
  }
  func.func @transform_6(%arg0: i32) -> (i32, i32) {
    %c0_i32 = arith.constant 0 : i32
    %c0_i32_0 = arith.constant 0 : i32
    return %arg0, %c0_i32 : i32, i32
  }
}

</mosaic_0001>

<bundles_post_ra>
// kernel: ins_mlp_forward.1
= control target key start
LH: loop header
LB: loop body
LE: loop exit
PB: predicated region body
PF: predicated region fallthrough
CT: control target
= control target key end

     0   :  { %v271_v1 = vmov 0.0   ;;  %vm272_vm0 = vmmov 0   ;;  %vm49_vm1 = vcmask 261120   ;;  %s351_s0 = inlined_call_operand.vmem [shape: f32[8,32], index: 0, kind: input, shape index: {}]   ;;  %s352_s1 = inlined_call_operand.vmem [shape: bf16[32,64], index: 1, kind: input, shape index: {}]   ;;  %s353_s2 = inlined_call_operand.vmem [shape: f32[1,64], index: 2, kind: input, shape index: {}]   ;;  %s354_s3 = inlined_call_operand.vmem [shape: bf16[64,4], index: 3, kind: input, shape index: {}]   ;;  %s355_s4 = inlined_call_operand.vmem [shape: f32[1,4], index: 4, kind: input, shape index: {}]   ;;  %s356_s5 = inlined_call_operand.vmem [shape: f32[8,4], index: 5, kind: output, shape index: {0}]   ;;  %s357_s6 = inlined_call_operand.hbm [shape: bf16[8,64], index: 6, kind: output, shape index: {1}]  }
   0x1   :  { %v241_v0 = vld [vmem:[%s352_s1] sm:$0xff]   ;;  %218 = vmatprep.subr.bf16.mxu0 %v271_v1  ;;  %v242_v2 = vld [vmem:[%s352_s1 + $0x8] sm:$0xff]   ;;  %226 = vmatprep.subr.bf16.mxu1 %v271_v1 }
   0x2   :  { %219 = vmatpush3.bf16.msra.mxu0 %v241_v0  ;;  %222 = vmatprep.mubr.msk.bf16.mxu0 %vm272_vm0, %v271_v1  ;;  %v24_v3 = vld [vmem:[%s351_s0] sm:$0xff]  ;;  %v244_v5 = vld [vmem:[%s354_s3 + $0x8] sm:$0xff]  }
   0x3   :  { %220 = vmatprep.subr.bf16.mxu0 %v271_v1  ;;  %v243_v4 = vld [vmem:[%s354_s3] sm:$0xff]   ;;  %234 = vmatprep.mubr.msk.bf16.mxu1 %vm272_vm0, %v271_v1  ;;  %v25_v6 = vpack.c.bf16 %v24_v3, %v24_v3 }
   0x4   :  { %227 = vmatpush3.bf16.msra.mxu1 %v243_v4 }
   0x5   :  { %228 = vmatprep.subr.bf16.mxu1 %v271_v1 }
   0x6   :  { %221 = vmatpush3.bf16.msra.mxu0 %v242_v2 }
   0x7   :  { %12 = vsyncpa [#allocation3], 0  ;;  %v245_v7 = vld [vmem:[%s354_s3 + $0x10] sm:$0xff]   ;;  %v246_v8 = vld [vmem:[%s354_s3 + $0x18] sm:$0xff]   ;;  %vm136_vm2 = vcmask 523264   ;;  %vm95_vm3 = vcmask 519168  }
   0x8   :  { %229 = vmatpush3.bf16.msra.mxu1 %v244_v5  ;;  %v200_v9 = vld [vmem:[%s353_s2] ss:$0 sm:$0xff]  ;;  %s273_s11 = smov [#allocation2]  }
   0x9   :  { %223 = vmatmul.mubr.msk.bf16.vlgmr.msra.gmra.mrb[0].mxu0 %vm49_vm1, %v25_v6  ;;  %230 = vmatprep.subr.bf16.mxu1 %v271_v1  ;;  %s190_s12 = sshll.u32 %s273_s11, 4  ;;  %s191_s12 = int_to_ptr.vmem [resolvable:$true] %s190_s12 }
   0xa   :  { %s247_s3 = scalar_lea.vmem %s191_s12, 64  ;;  %p252_p1 = scmp.lt.s32.totalorder %s191_s12, %s191_s12 }
   0xb   :  { %p248_p0 = scmp.ne.s32.totalorder %s191_s12, %s247_s3  ;;  %p253_p2 = scmp.lt.s32.totalorder %s247_s3, %s247_s3 }
   0xc   :  { %231 = vmatpush3.bf16.msra.mxu1 %v245_v7 }
   0xd   :  { %232 = vmatprep.subr.bf16.mxu1 %v271_v1  ;;  %p254_p3 = por %p253_p2, %p252_p1 }
   0xf   :  { %p255_p4 = pnand %p254_p3, %p248_p0 }
  0x10   :  { %233 = vmatpush3.bf16.msra.mxu1 %v246_v8 }
  0xdc   :  { %v87_v10 = vpop.f32.mrb[0].mxu0 }
  0xdd   :  { %v88_v11 = vadd.f32 %v200_v9, %v87_v10  ;;  %v224_v12 = vpop.f32.mrb[1].mxu0 }
  0xde   :  { %v90_v13 = vpop.f32.mrb[2].mxu0 }
  0xdf   :  { %v93_v14 = vmax.f32 %v88_v11, 0.0  ;;  %v225_v15 = vpop.f32.mrb[3].mxu0 }
  0xe1   :  { %v94_v16 = vpack.c.bf16 %v93_v14, %v93_v14 }
  0xe3   :  { %235 = vmatmul.mubr.msk.bf16.vlgmr.msra.gmra.mrb[0].mxu1 %vm136_vm2, %v94_v16  ;;  %96 = vst.msk [vmem:[#allocation2] sm:$0xf] %vm95_vm3, %v94_v16 }
  0xe4   :  { %258 = shalt.err (!%p255_p4)
}
  0xe5   :  { %s259_s14 = scalar_lea.hbm %s357_s6, 64 }
  0xe6   :  { %p260_p5 = scmp.ne.s32.totalorder %s357_s6, %s259_s14  ;;  %p263_p6 = scmp.lt.u32.totalorder %s259_s14, %s357_s6 }
  0xe8   :  { %p265_p7 = pnand %p263_p6, %p260_p5 }
  0xea   :  { %268 = shalt.err (!%p265_p7)
}
  0xeb   :  { %193 = dma.vmem_to_hbm [thread:$0]  %s191_s12, 64, %s357_s6, [#allocation3]   ;;  %v204_v17 = vld [vmem:[%s355_s4] ss:$0 sm:$0xff]  ;;  %vm180_vm4 = vcmask 31744  }
 0x1b6   :  { %v174_v18 = vpop.f32.mrb[0].mxu1 }
 0x1b7   :  { %v175_v19 = vadd.f32 %v204_v17, %v174_v18  ;;  %v236_v20 = vpop.f32.mrb[1].mxu1 }
 0x1b8   :  { %v177_v21 = vpop.f32.mrb[2].mxu1 }
 0x1b9   :  { %181 = vst.msk [vmem:[%s356_s5] sm:$0xff] %vm180_vm4, %v175_v19  ;;  %v237_v22 = vpop.f32.mrb[3].mxu1 }
 0x1ba   :  { %269 = dma.done.wait [#allocation3], 64  }
 0x1bb   :  { %270 = vsyncadd [#allocation3], 4294967232 }
 0x1bc   :  { %199 = vsyncpa [#allocation3], 1 }

</bundles_post_ra>
